<compile_context>
chip_gen: v5e
topology: v5e:2x2
jax: 0.10.0
libtpu: 0.0.40
codegen_flags: <defaults>
</compile_context>

<pallas_src>
import functools
import math

import jax
import jax.numpy as jnp
from jax import lax
from jax.experimental import pallas as pl
from jax.experimental.pallas import tpu as pltpu


def _round_up(x, m):
    return ((x + m - 1) // m) * m


def _tpu_defaults():
    """Best-effort per-generation defaults: (vmem_cap, mxu_dim, tile_m, max_ff, approx_gelu)."""
    vmem_cap = 128 * 1024 * 1024
    try:
        info = pltpu.get_tpu_info()
        vmem_cap = int(getattr(info, "vmem_capacity_bytes", vmem_cap))
    except Exception:
        pass
    try:
        kind = jax.devices()[0].device_kind.lower()
    except Exception:
        kind = ""
    if "v7" in kind:
        # ~996 TF/s vs ~3.2 TB/s per TC -> ~310 FLOP/B threshold, but only 64 MiB VMEM.
        mxu, tile_m, max_ff, approx = 256, 512, 512, False
        vmem_cap = min(vmem_cap, 64 * 1024 * 1024)
    elif ("v5" in kind) or ("v4" in kind) or ("v3" in kind) or ("v2" in kind):
        # v5e-class: ~240 FLOP/B threshold; exact erf is VALU-bound -> tanh GELU default.
        mxu, tile_m, max_ff, approx = 128, 384, 1024, True
    else:
        # v6e: ~640 FLOP/B threshold -> big row tiles; 128 MiB VMEM.
        mxu, tile_m, max_ff, approx = 256, 1024, 1024, False
    return vmem_cap, mxu, tile_m, max_ff, approx


def _choose_tile_m(M, target, mxu):
    """Pick a row-tile size near `target`, aligned to the MXU dim, preferring a
    divisor of M (avoids a full HBM pad pass over the activations)."""
    align = mxu if M >= mxu else 8
    target = max(align, min(int(target), _round_up(M, align)))
    target = _round_up(target, align)
    if M % target == 0:
        return target, M
    t = (target // align) * align
    while t >= max(align, target // 2):
        if M % t == 0:
            return t, M
        t -= align
    return target, _round_up(M, target)


def _gelu(h, approx):
    if approx:
        # tanh approximation: runs on the EUP slot (cheap on v5e VALU), but does
        # NOT match torch.nn.GELU's default erf to 1e-4.
        c = math.sqrt(2.0 / math.pi)
        return 0.5 * h * (1.0 + jnp.tanh(c * (h + 0.044715 * h * h * h)))
    # Exact GELU, matches torch.nn.GELU default.
    return 0.5 * h * (1.0 + lax.erf(h * (1.0 / math.sqrt(2.0))))


def _ffn_single_kernel(x_ref, w1_ref, b1_ref, w2_ref, b2_ref, o_ref, *,
                       compute_dtype, approx_gelu):
    # Whole d_ff fits one chunk: no accumulator scratch / zero-init / final copy.
    x = x_ref[...].astype(compute_dtype)
    h = jnp.dot(x, w1_ref[...], preferred_element_type=jnp.float32) + b1_ref[...]
    h = _gelu(h, approx_gelu)
    acc = jnp.dot(h.astype(compute_dtype), w2_ref[...],
                  preferred_element_type=jnp.float32)
    o_ref[...] = (acc + b2_ref[...]).astype(o_ref.dtype)


def _ffn_chunked_kernel(x_ref, w1_ref, b1_ref, w2_ref, b2_ref, o_ref, acc_ref, *,
                        compute_dtype, approx_gelu):
    # x_ref:  (tile_m, d_model)   w1_ref: (d_model, tile_ff)  b1_ref: (1, tile_ff)
    # w2_ref: (tile_ff, d_model)  b2_ref: (1, d_model)
    # o_ref:  (tile_m, d_model)   acc_ref: (tile_m, d_model) f32 scratch
    k = pl.program_id(1)

    @pl.when(k == 0)
    def _():
        acc_ref[...] = jnp.zeros_like(acc_ref)

    x = x_ref[...].astype(compute_dtype)
    h = jnp.dot(x, w1_ref[...], preferred_element_type=jnp.float32) + b1_ref[...]
    h = _gelu(h, approx_gelu)
    acc_ref[...] += jnp.dot(h.astype(compute_dtype), w2_ref[...],
                            preferred_element_type=jnp.float32)

    @pl.when(k == pl.num_programs(1) - 1)
    def _():
        o_ref[...] = (acc_ref[...] + b2_ref[...]).astype(o_ref.dtype)


def feed_forward(x, w1, b1, w2, b2, *, tile_m=None, max_ff_chunk=None,
                 compute_dtype=jnp.bfloat16, approx_gelu=None,
                 weight_buffers=None):
    """x: (B, S, d_model). Returns (B, S, d_model) in x.dtype.

    Best performance: store w1/w2 in `compute_dtype` (the astype here is then a
    no-op, so no per-call HBM cast pass over the weights).
    """
    B, S, d_model = x.shape
    d_ff = w1.shape[1]
    M = B * S
    out_dtype = x.dtype

    vmem_cap, mxu, def_tile_m, def_max_ff, def_approx = _tpu_defaults()
    tile_m = def_tile_m if tile_m is None else int(tile_m)
    max_ff_chunk = def_max_ff if max_ff_chunk is None else int(max_ff_chunk)
    approx_gelu = def_approx if approx_gelu is None else bool(approx_gelu)

    x_item = jnp.dtype(compute_dtype).itemsize
    w_item = jnp.dtype(compute_dtype).itemsize
    o_item = jnp.dtype(out_dtype).itemsize

    # --- d_ff chunking: lane-aligned chunks streamed through VMEM. ---
    chunked = d_ff > max_ff_chunk
    if chunked:
        tile_ff = max(128, (max_ff_chunk // 128) * 128)
    else:
        tile_ff = d_ff

    # --- VMEM budget (respect physical capacity; 64 MiB on v7x). ---
    budget = max(vmem_cap - 8 * 1024 * 1024, 12 * 1024 * 1024)

    def weight_footprint(tff):
        # double-buffered w1 + w2 chunks + biases
        return 4 * d_model * tff * w_item + 2 * (tff + d_model) * 4

    while chunked and tile_ff > 128 and weight_footprint(tile_ff) > budget // 2:
        tile_ff = max(128, tile_ff // 2)
    d_ff_p = _round_up(d_ff, tile_ff) if chunked else d_ff

    per_row = d_model * (2 * x_item + 2 * o_item + (4 if chunked else 0))
    row_budget = max(budget - weight_footprint(tile_ff), per_row * 8)
    tile_m = min(tile_m, max(8, row_budget // per_row))

    # --- Row tiling: MXU-aligned, divisor-of-M preferred, pad as fallback. ---
    tile_m, M_p = _choose_tile_m(M, tile_m, mxu)

    # Cast x once in the wrapper: halves x-tile DMA bytes + VMEM buffers.
    x2d = x.reshape(M, d_model).astype(compute_dtype)
    if M_p != M:
        x2d = jnp.pad(x2d, ((0, M_p - M), (0, 0)))
    if d_ff_p != d_ff:
        # Zero padding along d_ff is exact: gelu(0)=0 and zero rows of w2 add 0.
        w1 = jnp.pad(w1, ((0, 0), (0, d_ff_p - d_ff)))
        b1 = jnp.pad(b1, (0, d_ff_p - d_ff))
        w2 = jnp.pad(w2, ((0, d_ff_p - d_ff), (0, 0)))

    # No-op when the caller already stores weights in compute_dtype.
    w1c = w1.astype(compute_dtype)
    w2c = w2.astype(compute_dtype)
    b1_2d = b1.reshape(1, d_ff_p).astype(jnp.float32)
    b2_2d = b2.reshape(1, d_model).astype(jnp.float32)

    n_row_tiles = M_p // tile_m
    n_ff_chunks = (d_ff_p // tile_ff) if chunked else 1

    vmem_bytes = (2 * tile_m * d_model * x_item            # x tiles
                  + 2 * tile_m * d_model * o_item          # out tiles
                  + weight_footprint(tile_ff)              # w1/w2 chunks + biases
                  + (tile_m * d_model * 4 if chunked else 0))
    vmem_limit = int(min(max(int(vmem_bytes * 1.5), 16 * 1024 * 1024),
                         vmem_cap - 4 * 1024 * 1024))

    cost = pl.CostEstimate(
        flops=4 * M * d_model * d_ff,                      # two matmuls
        transcendentals=M * d_ff,                          # erf / tanh
        bytes_accessed=int(M * d_model * (x_item + o_item)
                           + 2 * d_model * d_ff * w_item * n_row_tiles
                           + (d_ff + d_model) * 4))

    if not chunked:
        kernel = functools.partial(_ffn_single_kernel, compute_dtype=compute_dtype,
                                   approx_gelu=approx_gelu)
        out2d = pl.pallas_call(
            kernel,
            out_shape=jax.ShapeDtypeStruct((M_p, d_model), out_dtype),
            grid_spec=pltpu.PrefetchScalarGridSpec(
                num_scalar_prefetch=0,
                grid=(n_row_tiles,),
                in_specs=[
                    pl.BlockSpec((tile_m, d_model), lambda i: (i, 0)),
                    pl.BlockSpec((d_model, d_ff_p), lambda i: (0, 0)),
                    pl.BlockSpec((1, d_ff_p), lambda i: (0, 0)),
                    pl.BlockSpec((d_ff_p, d_model), lambda i: (0, 0)),
                    pl.BlockSpec((1, d_model), lambda i: (0, 0)),
                ],
                out_specs=pl.BlockSpec((tile_m, d_model), lambda i: (i, 0)),
            ),
            compiler_params=pltpu.CompilerParams(
                dimension_semantics=("parallel",),
                vmem_limit_bytes=vmem_limit),
            cost_estimate=cost,
        )(x2d, w1c, b1_2d, w2c, b2_2d)
    else:
        # Optional deeper multi-buffering of weight chunks (v6e/v5e headroom).
        w_kwargs = {}
        if weight_buffers is not None and int(weight_buffers) > 2:
            w_kwargs = dict(pipeline_mode=pl.Buffered(int(weight_buffers)))
        kernel = functools.partial(_ffn_chunked_kernel, compute_dtype=compute_dtype,
                                   approx_gelu=approx_gelu)
        out2d = pl.pallas_call(
            kernel,
            out_shape=jax.ShapeDtypeStruct((M_p, d_model), out_dtype),
            grid_spec=pltpu.PrefetchScalarGridSpec(
                num_scalar_prefetch=0,
                grid=(n_row_tiles, n_ff_chunks),
                in_specs=[
                    pl.BlockSpec((tile_m, d_model), lambda i, k: (i, 0)),
                    pl.BlockSpec((d_model, tile_ff), lambda i, k: (0, k), **w_kwargs),
                    pl.BlockSpec((1, tile_ff), lambda i, k: (0, k)),
                    pl.BlockSpec((tile_ff, d_model), lambda i, k: (k, 0), **w_kwargs),
                    pl.BlockSpec((1, d_model), lambda i, k: (0, 0)),
                ],
                out_specs=pl.BlockSpec((tile_m, d_model), lambda i, k: (i, 0)),
                scratch_shapes=[pltpu.VMEM((tile_m, d_model), jnp.float32)],
            ),
            compiler_params=pltpu.CompilerParams(
                dimension_semantics=("parallel", "arbitrary"),
                vmem_limit_bytes=vmem_limit),
            cost_estimate=cost,
        )(x2d, w1c, b1_2d, w2c, b2_2d)

    if M_p != M:
        out2d = out2d[:M]
    return out2d.reshape(B, S, d_model)


def init_params(key, d_model, d_ff):
    # Deterministic init mimicking nn.Linear defaults.
    k1, k2, k3, k4 = jax.random.split(key, 4)
    lim1 = 1.0 / math.sqrt(d_model)
    lim2 = 1.0 / math.sqrt(d_ff)
    w1 = jax.random.uniform(k1, (d_model, d_ff), jnp.float32, -lim1, lim1)
    b1 = jax.random.uniform(k2, (d_ff,), jnp.float32, -lim1, lim1)
    w2 = jax.random.uniform(k3, (d_ff, d_model), jnp.float32, -lim2, lim2)
    b2 = jax.random.uniform(k4, (d_model,), jnp.float32, -lim2, lim2)
    return w1, b1, w2, b2


def _reference(x, w1, b1, w2, b2, compute_dtype=jnp.float32, approx_gelu=False):
    """Same math as the kernel (matmul operands cast, f32 accumulation)."""
    h = jnp.dot(x.astype(compute_dtype), w1.astype(compute_dtype),
                preferred_element_type=jnp.float32) + b1
    h = _gelu(h, approx_gelu)
    return jnp.dot(h.astype(compute_dtype), w2.astype(compute_dtype),
                   preferred_element_type=jnp.float32) + b2


if __name__ == "__main__":
    key = jax.random.PRNGKey(0)
    kx, kp, kx2, kp2 = jax.random.split(key, 4)

    # --- Test 1: small shape, single d_ff chunk, bf16 compute, pre-cast weights. ---
    B, S, d_model, d_ff = 2, 8, 32, 64
    x = jax.random.normal(kx, (B, S, d_model), jnp.float32)
    w1, b1, w2, b2 = init_params(kp, d_model, d_ff)
    w1_bf, w2_bf = w1.astype(jnp.bfloat16), w2.astype(jnp.bfloat16)  # cast once, outside

    out = jax.block_until_ready(
        feed_forward(x, w1_bf, b1, w2_bf, b2, compute_dtype=jnp.bfloat16,
                     approx_gelu=False))
    ref_bf = _reference(x, w1, b1, w2, b2, compute_dtype=jnp.bfloat16)
    assert out.shape == (B, S, d_model)
    assert jnp.allclose(out, ref_bf, atol=1e-3, rtol=1e-3), "bf16 path mismatch"
    ref_f32 = _reference(x, w1, b1, w2, b2, compute_dtype=jnp.float32)
    assert jnp.allclose(out, ref_f32, atol=5e-2, rtol=5e-2), "bf16 drifted too far"

    # f32 compute path must match the torch-equivalent reference tightly (exact erf GELU).
    out_f32 = jax.block_until_ready(
        feed_forward(x, w1, b1, w2, b2, compute_dtype=jnp.float32, approx_gelu=False))
    assert jnp.allclose(out_f32, ref_f32, atol=1e-4, rtol=1e-4), "f32 path mismatch"

    # tanh-GELU (EUP) path runs and matches the tanh reference.
    out_tanh = jax.block_until_ready(
        feed_forward(x, w1, b1, w2, b2, compute_dtype=jnp.float32, approx_gelu=True))
    ref_tanh = _reference(x, w1, b1, w2, b2, compute_dtype=jnp.float32, approx_gelu=True)
    assert jnp.allclose(out_tanh, ref_tanh, atol=5e-3, rtol=5e-3), "tanh path mismatch"

    # --- Test 2: non-aligned row count + multiple d_ff chunks (accumulator path). ---
    B2, S2, d_model2, d_ff2 = 3, 5, 128, 256
    x2 = jax.random.normal(kx2, (B2, S2, d_model2), jnp.float32)
    p2 = init_params(kp2, d_model2, d_ff2)
    out2 = jax.block_until_ready(
        feed_forward(x2, *p2, max_ff_chunk=128, compute_dtype=jnp.float32,
                     approx_gelu=False))
    ref2 = _reference(x2, *p2, compute_dtype=jnp.float32)
    assert out2.shape == (B2, S2, d_model2)
    assert jnp.allclose(out2, ref2, atol=1e-4, rtol=1e-4), "chunked path mismatch"

    print("KERNEL_OK")
</pallas_src>

<mosaic_0001>
module attributes {stable_mosaic.version = 11 : i64} {
  func.func @_ffn_single_kernel(%arg0: i32, %arg1: memref<16x32xbf16, #tpu.memory_space<vmem>>, %arg2: memref<32x64xbf16, #tpu.memory_space<vmem>>, %arg3: memref<1x64xf32, #tpu.memory_space<vmem>>, %arg4: memref<64x32xbf16, #tpu.memory_space<vmem>>, %arg5: memref<1x32xf32, #tpu.memory_space<vmem>>, %arg6: memref<16x32xf32, #tpu.memory_space<vmem>>) attributes {dimension_semantics = [#tpu.dimension_semantics<parallel>], iteration_bounds = array<i64: 1>, scalar_prefetch = 0 : i64, scratch_operands = 0 : i64, tpu.core_type = #tpu.core_type<tc>, window_params = [{transform_indices = @transform_0, window_bounds = array<i64: 16, 32>}, {pipeline_mode = #tpu.pipeline_mode<synchronous>, transform_indices = @transform_1, window_bounds = array<i64: 32, 64>}, {pipeline_mode = #tpu.pipeline_mode<synchronous>, transform_indices = @transform_2, window_bounds = array<i64: 1, 64>}, {pipeline_mode = #tpu.pipeline_mode<synchronous>, transform_indices = @transform_3, window_bounds = array<i64: 64, 32>}, {pipeline_mode = #tpu.pipeline_mode<synchronous>, transform_indices = @transform_4, window_bounds = array<i64: 1, 32>}, {transform_indices = @transform_5, window_bounds = array<i64: 16, 32>}]} {
    %c0 = arith.constant 0 : index
    %c0_0 = arith.constant 0 : index
    %0 = vector.load %arg1[%c0, %c0_0] : memref<16x32xbf16, #tpu.memory_space<vmem>>, vector<16x32xbf16>
    %c0_1 = arith.constant 0 : index
    %c0_2 = arith.constant 0 : index
    %1 = vector.load %arg2[%c0_1, %c0_2] : memref<32x64xbf16, #tpu.memory_space<vmem>>, vector<32x64xbf16>
    %cst = arith.constant dense<0.000000e+00> : vector<16x64xf32>
    %2 = tpu.matmul %0, %1, %cst {dimension_numbers = #tpu.dot_dimension_numbers<[1], [0], [0], [1], [0, 0, 1, 1], [], []>} : vector<16x32xbf16>, vector<32x64xbf16>, vector<16x64xf32> -> vector<16x64xf32>
    %c0_3 = arith.constant 0 : index
    %c0_4 = arith.constant 0 : index
    %3 = vector.load %arg3[%c0_3, %c0_4] : memref<1x64xf32, #tpu.memory_space<vmem>>, vector<1x64xf32>
    %4 = vector.broadcast %3 : vector<1x64xf32> to vector<16x64xf32>
    %5 = arith.addf %2, %4 : vector<16x64xf32>
    %cst_5 = arith.constant 5.000000e-01 : f32
    %6 = vector.broadcast %cst_5 : f32 to vector<16x64xf32>
    %7 = arith.mulf %6, %5 : vector<16x64xf32>
    %cst_6 = arith.constant 0.707106769 : f32
    %8 = vector.broadcast %cst_6 : f32 to vector<16x64xf32>
    %9 = arith.mulf %5, %8 : vector<16x64xf32>
    %10 = math.erf %9 : vector<16x64xf32>
    %cst_7 = arith.constant 1.000000e+00 : f32
    %11 = vector.broadcast %cst_7 : f32 to vector<16x64xf32>
    %12 = arith.addf %11, %10 : vector<16x64xf32>
    %13 = arith.mulf %7, %12 : vector<16x64xf32>
    %14 = arith.truncf %13 : vector<16x64xf32> to vector<16x64xbf16>
    %c0_8 = arith.constant 0 : index
    %c0_9 = arith.constant 0 : index
    %15 = vector.load %arg4[%c0_8, %c0_9] : memref<64x32xbf16, #tpu.memory_space<vmem>>, vector<64x32xbf16>
    %cst_10 = arith.constant dense<0.000000e+00> : vector<16x32xf32>
    %16 = tpu.matmul %14, %15, %cst_10 {dimension_numbers = #tpu.dot_dimension_numbers<[1], [0], [0], [1], [0, 0, 1, 1], [], []>} : vector<16x64xbf16>, vector<64x32xbf16>, vector<16x32xf32> -> vector<16x32xf32>
    %c0_11 = arith.constant 0 : index
    %c0_12 = arith.constant 0 : index
    %17 = vector.load %arg5[%c0_11, %c0_12] : memref<1x32xf32, #tpu.memory_space<vmem>>, vector<1x32xf32>
    %18 = vector.broadcast %17 : vector<1x32xf32> to vector<16x32xf32>
    %19 = arith.addf %16, %18 : vector<16x32xf32>
    %c0_13 = arith.constant 0 : index
    %c0_14 = arith.constant 0 : index
    %20 = vector.load %arg6[%c0_13, %c0_14] : memref<16x32xf32, #tpu.memory_space<vmem>>, vector<16x32xf32>
    tpu.vector_store %arg6[%c0_13, %c0_14], %19 {strides = array<i32>} : memref<16x32xf32, #tpu.memory_space<vmem>>, vector<16x32xf32>,
    return
  }
  func.func @transform_0(%arg0: i32) -> (i32, i32) {
    %c0_i32 = arith.constant 0 : i32
    %c0_i32_0 = arith.constant 0 : i32
    return %arg0, %c0_i32 : i32, i32
  }
  func.func @transform_1(%arg0: i32) -> (i32, i32) {
    %c0_i32 = arith.constant 0 : i32
    %c0_i32_0 = arith.constant 0 : i32
    %c0_i32_1 = arith.constant 0 : i32
    return %c0_i32, %c0_i32_0 : i32, i32
  }
  func.func @transform_2(%arg0: i32) -> (i32, i32) {
    %c0_i32 = arith.constant 0 : i32
    %c0_i32_0 = arith.constant 0 : i32
    %c0_i32_1 = arith.constant 0 : i32
    return %c0_i32, %c0_i32_0 : i32, i32
  }
  func.func @transform_3(%arg0: i32) -> (i32, i32) {
    %c0_i32 = arith.constant 0 : i32
    %c0_i32_0 = arith.constant 0 : i32
    %c0_i32_1 = arith.constant 0 : i32
    return %c0_i32, %c0_i32_0 : i32, i32
  }
  func.func @transform_4(%arg0: i32) -> (i32, i32) {
    %c0_i32 = arith.constant 0 : i32
    %c0_i32_0 = arith.constant 0 : i32
    %c0_i32_1 = arith.constant 0 : i32
    return %c0_i32, %c0_i32_0 : i32, i32
  }
  func.func @transform_5(%arg0: i32) -> (i32, i32) {
    %c0_i32 = arith.constant 0 : i32
    %c0_i32_0 = arith.constant 0 : i32
    return %arg0, %c0_i32 : i32, i32
  }
}

</mosaic_0001>

<bundles_post_ra>
// kernel: tpu_custom_call.1
= control target key start
LH: loop header
LB: loop body
LE: loop exit
PB: predicated region body
PF: predicated region fallthrough
CT: control target
= control target key end

     0   :  { %s388_s0 = inlined_call_operand.vmem [shape: bf16[16,32], index: 0, kind: input, shape index: {}]   ;;  %s389_s1 = inlined_call_operand.vmem [shape: bf16[32,64], index: 1, kind: input, shape index: {}]   ;;  %s390_s2 = inlined_call_operand.vmem [shape: f32[1,64], index: 2, kind: input, shape index: {}]   ;;  %s391_s3 = inlined_call_operand.vmem [shape: bf16[64,32], index: 3, kind: input, shape index: {}]   ;;  %s392_s4 = inlined_call_operand.vmem [shape: f32[1,32], index: 4, kind: input, shape index: {}]   ;;  %s393_s5 = inlined_call_operand.hbm [shape: f32[16,32], index: 5, kind: output, shape index: {}]  }
   0x1   :  { %v264_v0 = vld [vmem:[%s389_s1 + $0x8] sm:$0xff]  ;;  %v263_v1 = vld [vmem:[%s389_s1] sm:$0xff] }
   0x2   :  { %59 = vmatpush.bf16.msra.mxu0 %v264_v0 }
   0x3   :  { %10 = vsyncpa [#allocation3], 0  ;;  %v262_v2 = vld [vmem:[%s388_s0] sm:$0xff]  ;;  %vm49_vm0 = vcmask 261120   ;;  %v268_v22 = vld [vmem:[%s391_s3 + $0x18] sm:$0xff]  ;;  %vm192_vm9 = vcmask 523264  }
   0x4   :  { %v272_v3 = vld [vmem:[%s390_s2] ss:$0 sm:$0xff]  ;;  %200 = vmatpush.bf16.msra.mxu1 %v268_v22  ;;  %v267_v30 = vld [vmem:[%s391_s3 + $0x10] sm:$0xff]  ;;  %v266_v38 = vld [vmem:[%s391_s3 + $0x8] sm:$0xff]  ;;  %s304_s7 = smov [#allocation2]   ;;  %s218_s11 = sshll.u32 %s393_s5, 4  ;;  %s219_s11 = int_to_ptr.hbm [resolvable:$true] %s218_s11 }
   0x5   :  { %v265_v44 = vld [vmem:[%s391_s3] sm:$0xff]  ;;  %s216_s8 = sshll.u32 %s304_s7, 4  ;;  %s305_s12 = smov 128   ;;  %s217_s8 = int_to_ptr.vmem [resolvable:$true] %s216_s8 }
   0x6   :  { %60 = vmatpush.bf16.msra.mxu0 %v263_v1  ;;  %s306_s13 = smov 8  }
   0x8   :  { %201 = vmatpush.bf16.msra.mxu1 %v267_v30 }
   0x9   :  { %242 = vmatmul.msk.bf16.vlgmr.msra.gmra.mxu0 %vm49_vm0, %v262_v2 }
   0xc   :  { %202 = vmatpush.bf16.msra.mxu1 %v266_v38 }
  0x10   :  { %203 = vmatpush.bf16.msra.mxu1 %v265_v44 }
  0x86   :  { %v62_v4 = vpop.f32.mrf.mxu0 }
  0x87   :  { %v350_v5 = vadd.f32 %v272_v3, %v62_v4 }
  0x89   :  { %v353_v6 = vmul.f32 0.70710677, %v350_v5 }
  0x8b   :  { %v71_v7 = vmul.f32 %v353_v6, %v353_v6 }
  0x8d   :  { %v72_v8 = vmin.f32 %v71_v7, 16.0 }
  0x8e   :  { %v64_v9 = vpop.f32.mrf.mxu0 }
  0x8f   :  { %v73_v10 = vmul.f32 2.1237322e-06, %v72_v8  ;;  %v84_v11 = vmul.f32 3.8918573e-05, %v72_v8  ;;  %v357_v12 = vadd.f32 %v272_v3, %v64_v9 }
  0x91   :  { %v74_v13 = vadd.f32 0.00028619796, %v73_v10  ;;  %v85_v14 = vadd.f32 0.001143296, %v84_v11  ;;  %v360_v15 = vmul.f32 0.70710677, %v357_v12 }
  0x93   :  { %v86_v16 = vmul.f32 %v85_v14, %v72_v8  ;;  %v111_v17 = vmul.f32 %v360_v15, %v360_v15  ;;  %v75_v18 = vmul.f32 %v74_v13, %v72_v8 }
  0x95   :  { %v87_v19 = vadd.f32 0.014752088, %v86_v16  ;;  %v112_v20 = vmin.f32 %v111_v17, 16.0  ;;  %v76_v25 = vadd.f32 0.0036580483, %v75_v18 }
  0x97   :  { %v88_v21 = vmul.f32 %v87_v19, %v72_v8  ;;  %v113_v23 = vmul.f32 2.1237322e-06, %v112_v20  ;;  %v124_v24 = vmul.f32 3.8918573e-05, %v112_v20  ;;  %v77_v33 = vmul.f32 %v76_v25, %v72_v8 }
  0x98   :  { %v68_v25 = vmul.f32 0.5, %v357_v12 }
  0x99   :  { %v89_v26 = vadd.f32 0.112945676, %v88_v21  ;;  %v114_v27 = vadd.f32 0.00028619796, %v113_v23  ;;  %v125_v28 = vadd.f32 0.001143296, %v124_v24 }
  0x9a   :  { %v78_v40 = vadd.f32 0.05243302, %v77_v33  ;;  %v67_v24 = vmul.f32 0.5, %v350_v5 }
  0x9b   :  { %v90_v29 = vmul.f32 %v89_v26, %v72_v8  ;;  %v115_v31 = vmul.f32 %v114_v27, %v112_v20  ;;  %v126_v32 = vmul.f32 %v125_v28, %v112_v20 }
  0x9c   :  { %v79_v46 = vmul.f32 %v78_v40, %v72_v8 }
  0x9d   :  { %v91_v34 = vadd.f32 0.4994258, %v90_v29  ;;  %v116_v35 = vadd.f32 0.0036580483, %v115_v31  ;;  %v127_v36 = vadd.f32 0.014752088, %v126_v32 }
  0x9e   :  { %v80_v51 = vadd.f32 0.18741608, %v79_v46 }
  0x9f   :  { %v92_v37 = vmul.f32 %v91_v34, %v72_v8  ;;  %v128_v39 = vmul.f32 %v127_v36, %v112_v20  ;;  %v117_v42 = vmul.f32 %v116_v35, %v112_v20 }
  0xa0   :  { %v81_v56 = vmul.f32 %v80_v51, %v72_v8 }
  0xa1   :  { %v93_v41 = vadd.f32 1.0, %v92_v37  ;;  %v129_v43 = vadd.f32 0.112945676, %v128_v39  ;;  %v118_v47 = vadd.f32 0.05243302, %v117_v42 }
  0xa2   :  { %v82_v62 = vadd.f32 1.1283791, %v81_v56 }
  0xa3   :  { %274 = vrcp.f32 %v93_v41  ;;  %v130_v45 = vmul.f32 %v129_v43, %v112_v20  ;;  %v119_v53 = vmul.f32 %v118_v47, %v112_v20  ;;  %v105_v58 = vand.u32 2147483648, %v93_v41 }
  0xa4   :  { %v103_v60 = vand.u32 2147483647, %v93_v41  ;;  %vm99_vm2 = vweird.f32 %v93_v41  ;;  %v83_v7 = vmul.f32 %v82_v62, %v353_v6 }
  0xa5   :  { %v131_v48 = vadd.f32 0.4994258, %v130_v45  ;;  %v120_v59 = vadd.f32 0.18741608, %v119_v53  ;;  %v106_v1 = vor.u32 1.1754944e-38, %v105_v58 }
  0xa6   :  { %vm104_vm4 = vcmp.eq.f32.partialorder %v103_v60, 8.507059e+37 }
  0xa7   :  { %v132_v49 = vmul.f32 %v131_v48, %v112_v20  ;;  %v121_v2 = vmul.f32 %v120_v59, %v112_v20 }
  0xa9   :  { %v275_v50 = vpop.eup %274  ;;  %v133_v54 = vadd.f32 1.0, %v132_v49  ;;  %v122_v8 = vadd.f32 1.1283791, %v121_v2 }
  0xaa   :  { %v95_v52 = vmul.f32 %v275_v50, %v93_v41  ;;  %vm100_vm1 = vweird.f32 %v275_v50 }
  0xab   :  { %276 = vrcp.f32 %v133_v54  ;;  %vm101_vm3 = vmor %vm99_vm2, %vm100_vm1  ;;  %v145_v10 = vand.u32 2147483648, %v133_v54  ;;  %v143_v14 = vand.u32 2147483647, %v133_v54  ;;  %vm139_vm6 = vweird.f32 %v133_v54 }
  0xac   :  { %v96_v55 = vsub.f32 1.0, %v95_v52  ;;  %v123_v19 = vmul.f32 %v122_v8, %v360_v15  ;;  %v273_v15 = vld [vmem:[%s392_s4] ss:$0 sm:$0xff] }
  0xad   :  { %v146_v17 = vor.u32 1.1754944e-38, %v145_v10  ;;  %vm144_vm8 = vcmp.eq.f32.partialorder %v143_v14, 8.507059e+37 }
  0xae   :  { %v97_v57 = vmul.f32 %v275_v50, %v96_v55 }
  0xb0   :  { %v98_v61 = vadd.f32 %v275_v50, %v97_v57 }
  0xb1   :  { %v277_v63 = vpop.eup %276 }
  0xb2   :  { %v102_v0 = vsel %vm101_vm3, %v275_v50, %v98_v61  ;;  %v135_v3 = vmul.f32 %v277_v63, %v133_v54  ;;  %vm140_vm5 = vweird.f32 %v277_v63 }
  0xb3   :  { %v107_v4 = vsel %vm104_vm4, %v106_v1, %v102_v0  ;;  %vm141_vm7 = vmor %vm139_vm6, %vm140_vm5 }
  0xb4   :  { %v136_v9 = vsub.f32 1.0, %v135_v3  ;;  %v108_v11 = vmul.f32 %v107_v4, %v83_v7 }
  0xb6   :  { %v137_v13 = vmul.f32 %v277_v63, %v136_v9  ;;  %v243_v18 = vclamps-f32 %v108_v11, 1.0 }
  0xb8   :  { %v138_v16 = vadd.f32 %v277_v63, %v137_v13  ;;  %v151_v23 = vadd.f32 1.0, %v243_v18 }
  0xba   :  { %v142_v20 = vsel %vm141_vm7, %v277_v63, %v138_v16  ;;  %v153_v27 = vmul.f32 %v151_v23, %v67_v24 }
  0xbb   :  { %v147_v21 = vsel %vm144_vm8, %v146_v17, %v142_v20 }
  0xbc   :  { %v148_v22 = vmul.f32 %v147_v21, %v123_v19 }
  0xbe   :  { %v244_v6 = vclamps-f32 %v148_v22, 1.0 }
  0xc0   :  { %v152_v26 = vadd.f32 1.0, %v244_v6 }
  0xc2   :  { %v154_v28 = vmul.f32 %v152_v26, %v68_v25 }
  0xc4   :  { %v155_v29 = vpack.c.bf16 %v154_v28, %v153_v27 }
  0xc6   :  { %261 = vmatmul.msk.bf16.vlgmr.msra.gmra.mxu1 %vm192_vm9, %v155_v29 }
 0x143   :  { %v205_v30 = vpop.f32.mrf.mxu1 }
 0x144   :  { %v206_v31 = vadd.f32 %v273_v15, %v205_v30 }
 0x146   :  { %210 = vst.msk [vmem:[#allocation2] sm:$0xff] %vm49_vm0, %v206_v31 }
 0x14b   :  { %v207_v5 = vpop.f32.mrf.mxu1 }
 0x14c   :  { %v208_v12 = vadd.f32 %v273_v15, %v207_v5 }
 0x14e   :  { %211 = vst.msk [vmem:[#allocation2 + $0x8] sm:$0xff] %vm49_vm0, %v208_v12 }
 0x14f   :  { %224 = dma.vmem_to_hbm [thread:$0]  %s217_s8, 256, %s219_s11, [#allocation3], %s305_s12, %s305_s12, %s306_s13  }
 0x150   :  { %302 = dma.done.wait [#allocation3], 256  }
 0x151   :  { %303 = vsyncadd [#allocation3], 4294967040 }
 0x152   :  { %229 = vsyncpa [#allocation3], 1 }

</bundles_post_ra>
